<compile_context>
chip_gen: v5e
topology: v5e:2x2
jax: 0.10.0
libtpu: 0.0.40
codegen_flags: <defaults>
</compile_context>

<pallas_src>
import functools

import jax
import jax.numpy as jnp
from jax.experimental import pallas as pl
from jax.experimental.pallas import tpu as pltpu

IN_DIM = 784
H1, H2, H3_PAD, OUT = 256, 128, 128, 10   # fc3/fc4 hidden padded 64 -> 128
H3_REAL = 64


def _mlp_kernel(x_ref, w1_ref, b1_ref, w2_ref, b2_ref, w3_ref, b3_ref,
                w4_ref, b4_ref, o_ref):
    """One batch tile of the full forward pass.

    Weights are bf16 (MXU-native); accumulation, bias, ReLU and log_softmax
    run in f32 (v5e's VPU/EUP has no bf16 path).
    """
    x = x_ref[...].astype(jnp.bfloat16)                              # (TB, 784)

    # fc1 + relu
    h = jnp.dot(x, w1_ref[...], preferred_element_type=jnp.float32) + b1_ref[...]
    h = jnp.maximum(h, 0.0)

    # fc2 + relu
    h = jnp.dot(h.astype(jnp.bfloat16), w2_ref[...],
                preferred_element_type=jnp.float32) + b2_ref[...]
    h = jnp.maximum(h, 0.0)

    # fc3 + relu (lane-padded to 128; padded columns stay exactly 0)
    h = jnp.dot(h.astype(jnp.bfloat16), w3_ref[...],
                preferred_element_type=jnp.float32) + b3_ref[...]
    h = jnp.maximum(h, 0.0)

    # fc4 logits (padded w4 rows are zero, so padding contributes nothing)
    logits = jnp.dot(h.astype(jnp.bfloat16), w4_ref[...],
                     preferred_element_type=jnp.float32) + b4_ref[...]  # (TB, 10)

    # numerically-stable log_softmax over dim=1
    m = jnp.max(logits, axis=1, keepdims=True)
    shifted = logits - m
    lse = jnp.log(jnp.sum(jnp.exp(shifted), axis=1, keepdims=True))
    o_ref[...] = shifted - lse


@functools.partial(jax.jit, static_argnames=("batch_tile",))
def classifier_forward(x_nchw, params, *, batch_tile=256):
    """x_nchw: (B, 1, 28, 28) float32 -> (B, 10) float32 log-probabilities."""
    b = x_nchw.shape[0]
    x = x_nchw.reshape(b, -1).astype(jnp.float32)   # same as torch x.view(B, -1)
    w1, b1, w2, b2, w3, b3, w4, b4 = params

    if b <= batch_tile:
        # Tiny batch: single invocation — adding grid steps only adds overhead.
        tb, b_pad = b, b
    else:
        tb = batch_tile
        b_pad = pl.cdiv(b, tb) * tb
        if b_pad != b:
            x = jnp.pad(x, ((0, b_pad - b), (0, 0)))   # zero rows are harmless

    grid = (b_pad // tb,)

    # Weights/biases: full-array blocks with constant index_map -> VMEM-resident
    # across all grid steps (DMA'd once, not per step).
    def resident(arr):
        return pl.BlockSpec(arr.shape, lambda i: (0,) * arr.ndim)

    in_specs = [pl.BlockSpec((tb, IN_DIM), lambda i: (i, 0))]
    in_specs += [resident(p) for p in (w1, b1, w2, b2, w3, b3, w4, b4)]

    flops = 2 * b_pad * (IN_DIM * H1 + H1 * H2 + H2 * H3_PAD + H3_PAD * OUT)
    weight_bytes = sum(int(p.size) * p.dtype.itemsize for p in params)
    bytes_accessed = int(x.size) * 4 + weight_bytes + b_pad * OUT * 4

    out = pl.pallas_call(
        _mlp_kernel,
        out_shape=jax.ShapeDtypeStruct((b_pad, OUT), jnp.float32),
        grid=grid,
        in_specs=in_specs,
        out_specs=pl.BlockSpec((tb, OUT), lambda i: (i, 0)),
        compiler_params=pltpu.CompilerParams(
            dimension_semantics=("parallel",)),
        cost_estimate=pl.CostEstimate(
            flops=flops,
            transcendentals=b_pad * OUT,
            bytes_accessed=bytes_accessed),
    )(x, w1, b1, w2, b2, w3, b3, w4, b4)

    return out[:b]


def init_params(key):
    """nn.Linear-style U(-1/sqrt(fan_in), 1/sqrt(fan_in)) init.

    Weights stored as (in_features, out_features) bf16 (so the kernel does
    x @ W + b, matching PyTorch's x @ W.T + b). fc3 output / fc4 input are
    zero-padded 64 -> 128 lanes (exact). Biases kept f32 and 2-D.
    """
    def linear(k, fan_in, fan_out):
        kw, kb = jax.random.split(k)
        bound = 1.0 / (fan_in ** 0.5)
        w = jax.random.uniform(kw, (fan_in, fan_out), jnp.float32, -bound, bound)
        bvec = jax.random.uniform(kb, (1, fan_out), jnp.float32, -bound, bound)
        return w, bvec

    w1, b1 = linear(jax.random.fold_in(key, 0), 784, 256)
    w2, b2 = linear(jax.random.fold_in(key, 1), 256, 128)
    w3, b3 = linear(jax.random.fold_in(key, 2), 128, H3_REAL)
    w4, b4 = linear(jax.random.fold_in(key, 3), H3_REAL, 10)

    pad = H3_PAD - H3_REAL
    w3 = jnp.pad(w3, ((0, 0), (0, pad)))    # zero output columns
    b3 = jnp.pad(b3, ((0, 0), (0, pad)))    # zero bias entries
    w4 = jnp.pad(w4, ((0, pad), (0, 0)))    # zero input rows

    bf = lambda w: w.astype(jnp.bfloat16)
    return (bf(w1), b1, bf(w2), b2, bf(w3), b3, bf(w4), b4)


def reference_forward(x_nchw, params):
    """Pure-JAX reference mimicking the kernel's bf16-weight / f32-accum math."""
    b = x_nchw.shape[0]
    x = x_nchw.reshape(b, -1).astype(jnp.float32)
    w1, b1, w2, b2, w3, b3, w4, b4 = params

    def dense(h, w, bias):
        return jnp.dot(h.astype(jnp.bfloat16), w,
                       preferred_element_type=jnp.float32) + bias

    h = jax.nn.relu(dense(x, w1, b1))
    h = jax.nn.relu(dense(h, w2, b2))
    h = jax.nn.relu(dense(h, w3, b3))
    logits = dense(h, w4, b4)
    return jax.nn.log_softmax(logits, axis=1)


if __name__ == "__main__":
    key = jax.random.PRNGKey(0)
    k_params, k_x1, k_x2 = jax.random.split(key, 3)

    params = init_params(k_params)

    # Tiny MNIST-like batch (single-invocation, latency-bound path).
    x_small = jax.random.normal(k_x1, (8, 1, 28, 28), jnp.float32)
    out_small = jax.block_until_ready(classifier_forward(x_small, params))
    ref_small = reference_forward(x_small, params)
    assert out_small.shape == (8, 10)
    assert jnp.allclose(out_small, ref_small, atol=2e-3, rtol=2e-3), \
        "small-batch mismatch vs reference"
    assert jnp.allclose(jnp.sum(jnp.exp(out_small), axis=1), 1.0, atol=1e-4)

    # Larger non-multiple batch: exercises the gridded / pipelined path
    # (600 -> padded 768 -> 3 grid steps of TB=256, weights resident).
    x_big = jax.random.normal(k_x2, (600, 1, 28, 28), jnp.float32)
    out_big = jax.block_until_ready(classifier_forward(x_big, params))
    ref_big = reference_forward(x_big, params)
    assert out_big.shape == (600, 10)
    assert jnp.allclose(out_big, ref_big, atol=2e-3, rtol=2e-3), \
        "gridded-batch mismatch vs reference"
    assert jnp.allclose(jnp.sum(jnp.exp(out_big), axis=1), 1.0, atol=1e-4)

    print("KERNEL_OK")
</pallas_src>

<mosaic_0001>
module attributes {stable_mosaic.version = 11 : i64} {
  func.func @_mlp_kernel(%arg0: i32, %arg1: memref<8x784xf32, #tpu.memory_space<vmem>>, %arg2: memref<784x256xbf16, #tpu.memory_space<vmem>>, %arg3: memref<1x256xf32, #tpu.memory_space<vmem>>, %arg4: memref<256x128xbf16, #tpu.memory_space<vmem>>, %arg5: memref<1x128xf32, #tpu.memory_space<vmem>>, %arg6: memref<128x128xbf16, #tpu.memory_space<vmem>>, %arg7: memref<1x128xf32, #tpu.memory_space<vmem>>, %arg8: memref<128x10xbf16, #tpu.memory_space<vmem>>, %arg9: memref<1x10xf32, #tpu.memory_space<vmem>>, %arg10: memref<8x10xf32, #tpu.memory_space<vmem>>) attributes {dimension_semantics = [#tpu.dimension_semantics<parallel>], iteration_bounds = array<i64: 1>, scalar_prefetch = 0 : i64, scratch_operands = 0 : i64, tpu.core_type = #tpu.core_type<tc>, window_params = [{transform_indices = @transform_0, window_bounds = array<i64: 8, 784>}, {pipeline_mode = #tpu.pipeline_mode<synchronous>, transform_indices = @transform_1, window_bounds = array<i64: 784, 256>}, {pipeline_mode = #tpu.pipeline_mode<synchronous>, transform_indices = @transform_2, window_bounds = array<i64: 1, 256>}, {pipeline_mode = #tpu.pipeline_mode<synchronous>, transform_indices = @transform_3, window_bounds = array<i64: 256, 128>}, {pipeline_mode = #tpu.pipeline_mode<synchronous>, transform_indices = @transform_4, window_bounds = array<i64: 1, 128>}, {pipeline_mode = #tpu.pipeline_mode<synchronous>, transform_indices = @transform_5, window_bounds = array<i64: 128, 128>}, {pipeline_mode = #tpu.pipeline_mode<synchronous>, transform_indices = @transform_6, window_bounds = array<i64: 1, 128>}, {pipeline_mode = #tpu.pipeline_mode<synchronous>, transform_indices = @transform_7, window_bounds = array<i64: 128, 10>}, {pipeline_mode = #tpu.pipeline_mode<synchronous>, transform_indices = @transform_8, window_bounds = array<i64: 1, 10>}, {transform_indices = @transform_9, window_bounds = array<i64: 8, 10>}]} {
    %c0 = arith.constant 0 : index
    %c0_0 = arith.constant 0 : index
    %0 = vector.load %arg1[%c0, %c0_0] : memref<8x784xf32, #tpu.memory_space<vmem>>, vector<8x784xf32>
    %1 = arith.truncf %0 : vector<8x784xf32> to vector<8x784xbf16>
    %c0_1 = arith.constant 0 : index
    %c0_2 = arith.constant 0 : index
    %2 = vector.load %arg2[%c0_1, %c0_2] : memref<784x256xbf16, #tpu.memory_space<vmem>>, vector<784x256xbf16>
    %cst = arith.constant dense<0.000000e+00> : vector<8x256xf32>
    %3 = tpu.matmul %1, %2, %cst {dimension_numbers = #tpu.dot_dimension_numbers<[1], [0], [0], [1], [0, 0, 1, 1], [], []>} : vector<8x784xbf16>, vector<784x256xbf16>, vector<8x256xf32> -> vector<8x256xf32>
    %c0_3 = arith.constant 0 : index
    %c0_4 = arith.constant 0 : index
    %4 = vector.load %arg3[%c0_3, %c0_4] : memref<1x256xf32, #tpu.memory_space<vmem>>, vector<1x256xf32>
    %5 = vector.broadcast %4 : vector<1x256xf32> to vector<8x256xf32>
    %6 = arith.addf %3, %5 : vector<8x256xf32>
    %cst_5 = arith.constant 0.000000e+00 : f32
    %7 = vector.broadcast %cst_5 : f32 to vector<8x256xf32>
    %8 = arith.maximumf %6, %7 : vector<8x256xf32>
    %9 = arith.truncf %8 : vector<8x256xf32> to vector<8x256xbf16>
    %c0_6 = arith.constant 0 : index
    %c0_7 = arith.constant 0 : index
    %10 = vector.load %arg4[%c0_6, %c0_7] : memref<256x128xbf16, #tpu.memory_space<vmem>>, vector<256x128xbf16>
    %cst_8 = arith.constant dense<0.000000e+00> : vector<8x128xf32>
    %11 = tpu.matmul %9, %10, %cst_8 {dimension_numbers = #tpu.dot_dimension_numbers<[1], [0], [0], [1], [0, 0, 1, 1], [], []>} : vector<8x256xbf16>, vector<256x128xbf16>, vector<8x128xf32> -> vector<8x128xf32>
    %c0_9 = arith.constant 0 : index
    %c0_10 = arith.constant 0 : index
    %12 = vector.load %arg5[%c0_9, %c0_10] : memref<1x128xf32, #tpu.memory_space<vmem>>, vector<1x128xf32>
    %13 = vector.broadcast %12 : vector<1x128xf32> to vector<8x128xf32>
    %14 = arith.addf %11, %13 : vector<8x128xf32>
    %cst_11 = arith.constant 0.000000e+00 : f32
    %15 = vector.broadcast %cst_11 : f32 to vector<8x128xf32>
    %16 = arith.maximumf %14, %15 : vector<8x128xf32>
    %17 = arith.truncf %16 : vector<8x128xf32> to vector<8x128xbf16>
    %c0_12 = arith.constant 0 : index
    %c0_13 = arith.constant 0 : index
    %18 = vector.load %arg6[%c0_12, %c0_13] : memref<128x128xbf16, #tpu.memory_space<vmem>>, vector<128x128xbf16>
    %cst_14 = arith.constant dense<0.000000e+00> : vector<8x128xf32>
    %19 = tpu.matmul %17, %18, %cst_14 {dimension_numbers = #tpu.dot_dimension_numbers<[1], [0], [0], [1], [0, 0, 1, 1], [], []>} : vector<8x128xbf16>, vector<128x128xbf16>, vector<8x128xf32> -> vector<8x128xf32>
    %c0_15 = arith.constant 0 : index
    %c0_16 = arith.constant 0 : index
    %20 = vector.load %arg7[%c0_15, %c0_16] : memref<1x128xf32, #tpu.memory_space<vmem>>, vector<1x128xf32>
    %21 = vector.broadcast %20 : vector<1x128xf32> to vector<8x128xf32>
    %22 = arith.addf %19, %21 : vector<8x128xf32>
    %cst_17 = arith.constant 0.000000e+00 : f32
    %23 = vector.broadcast %cst_17 : f32 to vector<8x128xf32>
    %24 = arith.maximumf %22, %23 : vector<8x128xf32>
    %25 = arith.truncf %24 : vector<8x128xf32> to vector<8x128xbf16>
    %c0_18 = arith.constant 0 : index
    %c0_19 = arith.constant 0 : index
    %26 = vector.load %arg8[%c0_18, %c0_19] : memref<128x10xbf16, #tpu.memory_space<vmem>>, vector<128x10xbf16>
    %cst_20 = arith.constant dense<0.000000e+00> : vector<8x10xf32>
    %27 = tpu.matmul %25, %26, %cst_20 {dimension_numbers = #tpu.dot_dimension_numbers<[1], [0], [0], [1], [0, 0, 1, 1], [], []>} : vector<8x128xbf16>, vector<128x10xbf16>, vector<8x10xf32> -> vector<8x10xf32>
    %c0_21 = arith.constant 0 : index
    %c0_22 = arith.constant 0 : index
    %28 = vector.load %arg9[%c0_21, %c0_22] : memref<1x10xf32, #tpu.memory_space<vmem>>, vector<1x10xf32>
    %29 = vector.broadcast %28 : vector<1x10xf32> to vector<8x10xf32>
    %30 = arith.addf %27, %29 : vector<8x10xf32>
    %cst_23 = arith.constant dense<0xFF800000> : vector<8xf32>
    %31 = vector.multi_reduction <maximumf>, %30, %cst_23 [1] : vector<8x10xf32> to vector<8xf32>
    %32 = vector.shape_cast %31 : vector<8xf32> to vector<8x1xf32>
    %33 = vector.broadcast %32 : vector<8x1xf32> to vector<8x10xf32>
    %34 = arith.subf %30, %33 : vector<8x10xf32>
    %35 = math.exp %34 : vector<8x10xf32>
    %cst_24 = arith.constant dense<0.000000e+00> : vector<8xf32>
    %36 = vector.multi_reduction <add>, %35, %cst_24 [1] : vector<8x10xf32> to vector<8xf32>
    %37 = vector.shape_cast %36 : vector<8xf32> to vector<8x1xf32>
    %38 = math.log %37 : vector<8x1xf32>
    %39 = vector.broadcast %38 : vector<8x1xf32> to vector<8x10xf32>
    %40 = arith.subf %34, %39 : vector<8x10xf32>
    %c0_25 = arith.constant 0 : index
    %c0_26 = arith.constant 0 : index
    %41 = vector.load %arg10[%c0_25, %c0_26] : memref<8x10xf32, #tpu.memory_space<vmem>>, vector<8x10xf32>
    tpu.vector_store %arg10[%c0_25, %c0_26], %40 {strides = array<i32>} : memref<8x10xf32, #tpu.memory_space<vmem>>, vector<8x10xf32>,
    return
  }
  func.func @transform_0(%arg0: i32) -> (i32, i32) {
    %c0_i32 = arith.constant 0 : i32
    %c0_i32_0 = arith.constant 0 : i32
    return %arg0, %c0_i32 : i32, i32
  }
  func.func @transform_1(%arg0: i32) -> (i32, i32) {
    %c0_i32 = arith.constant 0 : i32
    %c0_i32_0 = arith.constant 0 : i32
    %c0_i32_1 = arith.constant 0 : i32
    return %c0_i32, %c0_i32_0 : i32, i32
  }
  func.func @transform_2(%arg0: i32) -> (i32, i32) {
    %c0_i32 = arith.constant 0 : i32
    %c0_i32_0 = arith.constant 0 : i32
    %c0_i32_1 = arith.constant 0 : i32
    return %c0_i32, %c0_i32_0 : i32, i32
  }
  func.func @transform_3(%arg0: i32) -> (i32, i32) {
    %c0_i32 = arith.constant 0 : i32
    %c0_i32_0 = arith.constant 0 : i32
    %c0_i32_1 = arith.constant 0 : i32
    return %c0_i32, %c0_i32_0 : i32, i32
  }
  func.func @transform_4(%arg0: i32) -> (i32, i32) {
    %c0_i32 = arith.constant 0 : i32
    %c0_i32_0 = arith.constant 0 : i32
    %c0_i32_1 = arith.constant 0 : i32
    return %c0_i32, %c0_i32_0 : i32, i32
  }
  func.func @transform_5(%arg0: i32) -> (i32, i32) {
    %c0_i32 = arith.constant 0 : i32
    %c0_i32_0 = arith.constant 0 : i32
    %c0_i32_1 = arith.constant 0 : i32
    return %c0_i32, %c0_i32_0 : i32, i32
  }
  func.func @transform_6(%arg0: i32) -> (i32, i32) {
    %c0_i32 = arith.constant 0 : i32
    %c0_i32_0 = arith.constant 0 : i32
    %c0_i32_1 = arith.constant 0 : i32
    return %c0_i32, %c0_i32_0 : i32, i32
  }
  func.func @transform_7(%arg0: i32) -> (i32, i32) {
    %c0_i32 = arith.constant 0 : i32
    %c0_i32_0 = arith.constant 0 : i32
    %c0_i32_1 = arith.constant 0 : i32
    return %c0_i32, %c0_i32_0 : i32, i32
  }
  func.func @transform_8(%arg0: i32) -> (i32, i32) {
    %c0_i32 = arith.constant 0 : i32
    %c0_i32_0 = arith.constant 0 : i32
    %c0_i32_1 = arith.constant 0 : i32
    return %c0_i32, %c0_i32_0 : i32, i32
  }
  func.func @transform_9(%arg0: i32) -> (i32, i32) {
    %c0_i32 = arith.constant 0 : i32
    %c0_i32_0 = arith.constant 0 : i32
    return %arg0, %c0_i32 : i32, i32
  }
}

</mosaic_0001>

<bundles_post_ra>
// kernel: classifier_forward.1
= control target key start
LH: loop header
LB: loop body
LE: loop exit
PB: predicated region body
PF: predicated region fallthrough
CT: control target
= control target key end

     0   :  { %14 = vsyncpa [#allocation3], 0  ;;  %s2680_s0 = inlined_call_operand.vmem [shape: f32[8,784], index: 0, kind: input, shape index: {}]   ;;  %s2681_s1 = inlined_call_operand.vmem [shape: bf16[784,256], index: 1, kind: input, shape index: {}]   ;;  %s2682_s2 = inlined_call_operand.vmem [shape: f32[1,256], index: 2, kind: input, shape index: {}]   ;;  %s2683_s3 = inlined_call_operand.hbm [shape: bf16[256,128], index: 3, kind: input, shape index: {}]   ;;  %s2684_s4 = inlined_call_operand.vmem [shape: f32[1,128], index: 4, kind: input, shape index: {}]   ;;  %s2685_s5 = inlined_call_operand.vmem [shape: bf16[128,128], index: 5, kind: input, shape index: {}]   ;;  %s2686_s6 = inlined_call_operand.vmem [shape: f32[1,128], index: 6, kind: input, shape index: {}]   ;;  %s2687_s7 = inlined_call_operand.vmem [shape: bf16[128,10], index: 7, kind: input, shape index: {}]   ;;  %s2688_s8 = inlined_call_operand.vmem [shape: f32[1,10], index: 8, kind: input, shape index: {}]   ;;  %s2689_s9 = inlined_call_operand.hbm [shape: f32[8,10], index: 9, kind: output, shape index: {}]  }
   0x1   :  { %15 = vsyncpa [#allocation4], 0  ;;  %s26_s11 = sshll.u32 %s2683_s3, 4  ;;  %s1918_s12 = smov [#allocation2]   ;;  %s27_s11 = int_to_ptr.hbm [resolvable:$true] %s26_s11 }
   0x2   :  { %s28_s13 = sshll.u32 %s1918_s12, 4  ;;  %s1919_s14 = smov 64   ;;  %s29_s13 = int_to_ptr.vmem [resolvable:$true] %s28_s13 }
   0x3   :  { %s1920_s15 = smov 4  }
   0x4   :  { %34 = dma.hbm_to_vmem [thread:$0]  %s27_s11, 2048, %s29_s13, [#allocation3], %s1919_s14, %s1919_s14, %s1920_s15  }
   0x5   :  { %1914 = dma.done.wait [#allocation3], 2048  }
   0x6   :  { %1915 = vsyncadd [#allocation3], 4294965248  ;;  %v1261_v0 = vld [vmem:[%s2681_s1 + $0x70] sm:$0xf]  ;;  %v1740_v1 = vld [vmem:[%s2681_s1 + $0x74] sm:$0xf0] }
   0x7   :  { %v1389_v2 = vld [vmem:[%s2681_s1 + $0x170] sm:$0xf]  ;;  %v1262_v3 = vor.u32 %v1740_v1, %v1261_v0  ;;  %v1772_v4 = vld [vmem:[%s2681_s1 + $0x174] sm:$0xf0]  ;;  %v1253_v11 = vld [vmem:[%s2681_s1 + $0x60] sm:$0xf] }
   0x8   :  { %v1453_v5 = vld [vmem:[%s2681_s1 + $0x1f0] sm:$0xf]  ;;  %v1788_v6 = vld [vmem:[%s2681_s1 + $0x1f4] sm:$0xf0]  ;;  %v1390_v7 = vor.u32 %v1772_v4, %v1389_v2  ;;  %v1738_v13 = vld [vmem:[%s2681_s1 + $0x64] sm:$0xf0] }
   0x9   :  { %v1454_v8 = vor.u32 %v1788_v6, %v1453_v5  ;;  %v1325_v9 = vld [vmem:[%s2681_s1 + $0xf0] sm:$0xf]  ;;  %v1756_v10 = vld [vmem:[%s2681_s1 + $0xf4] sm:$0xf0]  ;;  %662 = vmatpush.bf16.msra.mxu0 %v1262_v3  ;;  %v1381_v14 = vld [vmem:[%s2681_s1 + $0x160] sm:$0xf]  ;;  %v1254_v16 = vor.u32 %v1738_v13, %v1253_v11 }
   0xa   :  { %v1326_v12 = vor.u32 %v1756_v10, %v1325_v9  ;;  %v1770_v15 = vld [vmem:[%s2681_s1 + $0x164] sm:$0xf0]  ;;  %688 = vmatpush.bf16.msra.mxu2 %v1390_v7  ;;  %v1445_v18 = vld [vmem:[%s2681_s1 + $0x1e0] sm:$0xf]  ;;  %v1245_v23 = vld [vmem:[%s2681_s1 + $0x50] sm:$0xf] }
   0xb   :  { %701 = vmatpush.bf16.msra.mxu3 %v1454_v8  ;;  %v1382_v17 = vor.u32 %v1770_v15, %v1381_v14  ;;  %v1786_v19 = vld [vmem:[%s2681_s1 + $0x1e4] sm:$0xf0]  ;;  %v1317_v20 = vld [vmem:[%s2681_s1 + $0xe0] sm:$0xf]  ;;  %v1736_v24 = vld [vmem:[%s2681_s1 + $0x54] sm:$0xf0] }
   0xc   :  { %675 = vmatpush.bf16.msra.mxu1 %v1326_v12  ;;  %v1446_v21 = vor.u32 %v1786_v19, %v1445_v18  ;;  %v1754_v22 = vld [vmem:[%s2681_s1 + $0xe4] sm:$0xf0]  ;;  %v1373_v26 = vld [vmem:[%s2681_s1 + $0x150] sm:$0xf]  ;;  %v1768_v27 = vld [vmem:[%s2681_s1 + $0x154] sm:$0xf0]  ;;  %v1246_v29 = vor.u32 %v1736_v24, %v1245_v23 }
   0xd   :  { %v1318_v25 = vor.u32 %v1754_v22, %v1317_v20  ;;  %v1437_v28 = vld [vmem:[%s2681_s1 + $0x1d0] sm:$0xf]  ;;  %663 = vmatpush.bf16.msra.mxu0 %v1254_v16  ;;  %v1784_v30 = vld [vmem:[%s2681_s1 + $0x1d4] sm:$0xf0]  ;;  %v1374_v33 = vor.u32 %v1768_v27, %v1373_v26  ;;  %v1237_v35 = vld [vmem:[%s2681_s1 + $0x40] sm:$0xf] }
   0xe   :  { %v1309_v31 = vld [vmem:[%s2681_s1 + $0xd0] sm:$0xf]  ;;  %v1752_v32 = vld [vmem:[%s2681_s1 + $0xd4] sm:$0xf0]  ;;  %689 = vmatpush.bf16.msra.mxu2 %v1382_v17  ;;  %v1438_v34 = vor.u32 %v1784_v30, %v1437_v28  ;;  %v1734_v36 = vld [vmem:[%s2681_s1 + $0x44] sm:$0xf0] }
   0xf   :  { %702 = vmatpush.bf16.msra.mxu3 %v1446_v21  ;;  %v1365_v37 = vld [vmem:[%s2681_s1 + $0x140] sm:$0xf]  ;;  %v1310_v38 = vor.u32 %v1752_v32, %v1309_v31  ;;  %v1766_v39 = vld [vmem:[%s2681_s1 + $0x144] sm:$0xf0]  ;;  %v1238_v44 = vor.u32 %v1734_v36, %v1237_v35  ;;  %v1229_v47 = vld [vmem:[%s2681_s1 + $0x30] sm:$0xf] }
  0x10   :  { %676 = vmatpush.bf16.msra.mxu1 %v1318_v25  ;;  %v1429_v40 = vld [vmem:[%s2681_s1 + $0x1c0] sm:$0xf]  ;;  %v1782_v41 = vld [vmem:[%s2681_s1 + $0x1c4] sm:$0xf0]  ;;  %v1366_v45 = vor.u32 %v1766_v39, %v1365_v37  ;;  %v1732_v48 = vld [vmem:[%s2681_s1 + $0x34] sm:$0xf0] }
  0x11   :  { %v1301_v42 = vld [vmem:[%s2681_s1 + $0xc0] sm:$0xf]  ;;  %v1750_v43 = vld [vmem:[%s2681_s1 + $0xc4] sm:$0xf0]  ;;  %664 = vmatpush.bf16.msra.mxu0 %v1246_v29  ;;  %v1430_v46 = vor.u32 %v1782_v41, %v1429_v40  ;;  %v1357_v49 = vld [vmem:[%s2681_s1 + $0x130] sm:$0xf]  ;;  %v1230_v56 = vor.u32 %v1732_v48, %v1229_v47 }
  0x12   :  { %690 = vmatpush.bf16.msra.mxu2 %v1374_v33  ;;  %v1302_v50 = vor.u32 %v1750_v43, %v1301_v42  ;;  %v1764_v51 = vld [vmem:[%s2681_s1 + $0x134] sm:$0xf0]  ;;  %v1421_v52 = vld [vmem:[%s2681_s1 + $0x1b0] sm:$0xf]  ;;  %v1221_v59 = vld [vmem:[%s2681_s1 + $0x20] sm:$0xf] }
  0x13   :  { %703 = vmatpush.bf16.msra.mxu3 %v1438_v34  ;;  %v1780_v53 = vld [vmem:[%s2681_s1 + $0x1b4] sm:$0xf0]  ;;  %v1293_v54 = vld [vmem:[%s2681_s1 + $0xb0] sm:$0xf]  ;;  %v1358_v57 = vor.u32 %v1764_v51, %v1357_v49  ;;  %v1730_v60 = vld [vmem:[%s2681_s1 + $0x24] sm:$0xf0] }
  0x14   :  { %677 = vmatpush.bf16.msra.mxu1 %v1310_v38  ;;  %v1748_v55 = vld [vmem:[%s2681_s1 + $0xb4] sm:$0xf0]  ;;  %v1422_v58 = vor.u32 %v1780_v53, %v1421_v52  ;;  %v1349_v61 = vld [vmem:[%s2681_s1 + $0x120] sm:$0xf]  ;;  %v1762_v63 = vld [vmem:[%s2681_s1 + $0x124] sm:$0xf0]  ;;  %v1222_v4 = vor.u32 %v1730_v60, %v1221_v59 }
  0x15   :  { %665 = vmatpush.bf16.msra.mxu0 %v1238_v44  ;;  %v1294_v62 = vor.u32 %v1748_v55, %v1293_v54  ;;  %v1413_v0 = vld [vmem:[%s2681_s1 + $0x1a0] sm:$0xf]  ;;  %v1778_v1 = vld [vmem:[%s2681_s1 + $0x1a4] sm:$0xf0]  ;;  %v1350_v5 = vor.u32 %v1762_v63, %v1349_v61  ;;  %v1213_v7 = vld [vmem:[%s2681_s1 + $0x10] sm:$0xf] }
  0x16   :  { %691 = vmatpush.bf16.msra.mxu2 %v1366_v45  ;;  %v1285_v2 = vld [vmem:[%s2681_s1 + $0xa0] sm:$0xf]  ;;  %v1746_v3 = vld [vmem:[%s2681_s1 + $0xa4] sm:$0xf0]  ;;  %v1414_v6 = vor.u32 %v1778_v1, %v1413_v0  ;;  %v1728_v8 = vld [vmem:[%s2681_s1 + $0x14] sm:$0xf0] }
  0x17   :  { %704 = vmatpush.bf16.msra.mxu3 %v1430_v46  ;;  %v1341_v9 = vld [vmem:[%s2681_s1 + $0x110] sm:$0xf]  ;;  %v1286_v10 = vor.u32 %v1746_v3, %v1285_v2  ;;  %v1760_v11 = vld [vmem:[%s2681_s1 + $0x114] sm:$0xf0]  ;;  %v1214_v16 = vor.u32 %v1728_v8, %v1213_v7  ;;  %v1205_v17 = vld [vmem:[%s2681_s1] sm:$0xf] }
  0x18   :  { %678 = vmatpush.bf16.msra.mxu1 %v1302_v50  ;;  %v1405_v12 = vld [vmem:[%s2681_s1 + $0x190] sm:$0xf]  ;;  %v1776_v13 = vld [vmem:[%s2681_s1 + $0x194] sm:$0xf0]  ;;  %v1726_v18 = vld [vmem:[%s2681_s1 + $0x4] sm:$0xf0]  ;;  %v1342_v20 = vor.u32 %v1760_v11, %v1341_v9 }
  0x19   :  { %666 = vmatpush.bf16.msra.mxu0 %v1230_v56  ;;  %v1277_v14 = vld [vmem:[%s2681_s1 + $0x90] sm:$0xf]  ;;  %v1744_v15 = vld [vmem:[%s2681_s1 + $0x94] sm:$0xf0]  ;;  %v1333_v19 = vld [vmem:[%s2681_s1 + $0x100] sm:$0xf]  ;;  %v1406_v21 = vor.u32 %v1776_v13, %v1405_v12  ;;  %v1206_v32 = vor.u32 %v1726_v18, %v1205_v17 }
  0x1a   :  { %692 = vmatpush.bf16.msra.mxu2 %v1358_v57  ;;  %v1758_v22 = vld [vmem:[%s2681_s1 + $0x104] sm:$0xf0]  ;;  %v1397_v23 = vld [vmem:[%s2681_s1 + $0x180] sm:$0xf]  ;;  %v1278_v25 = vor.u32 %v1744_v15, %v1277_v14  ;;  %v1517_v26 = vld [vmem:[%s2681_s1 + $0x270] sm:$0xf] }
  0x1b   :  { %705 = vmatpush.bf16.msra.mxu3 %v1422_v58  ;;  %v1774_v24 = vld [vmem:[%s2681_s1 + $0x184] sm:$0xf0]  ;;  %v1804_v27 = vld [vmem:[%s2681_s1 + $0x274] sm:$0xf0]  ;;  %v1739_v28 = vld [vmem:[%s2681_s1 + $0x74] sm:$0xf]  ;;  %v1334_v36 = vor.u32 %v1758_v22, %v1333_v19 }
  0x1c   :  { %679 = vmatpush.bf16.msra.mxu1 %v1294_v62  ;;  %v1263_v29 = vld [vmem:[%s2681_s1 + $0x78] sm:$0xf0]  ;;  %v1269_v30 = vld [vmem:[%s2681_s1 + $0x80] sm:$0xf]  ;;  %v1742_v31 = vld [vmem:[%s2681_s1 + $0x84] sm:$0xf0]  ;;  %v1398_v37 = vor.u32 %v1774_v24, %v1397_v23  ;;  %v1518_v41 = vor.u32 %v1804_v27, %v1517_v26 }
  0x1d   :  { %667 = vmatpush.bf16.msra.mxu0 %v1222_v4  ;;  %v52_v33 = vld [vmem:[%s2680_s0 + $0x10] sm:$0xff]  ;;  %v1589_v34 = vld [vmem:[%s2681_s1 + $0x300] sm:$0xf]  ;;  %v1822_v35 = vld [vmem:[%s2681_s1 + $0x304] sm:$0xf0]  ;;  %v1266_v42 = vor.u32 %v1739_v28, %v1263_v29  ;;  %v1270_v46 = vor.u32 %v1742_v31, %v1269_v30  ;;  %vm658_vm0 = vcmask 130048  }
  0x1e   :  { %693 = vmatpush.bf16.msra.mxu2 %v1350_v5  ;;  %v1581_v38 = vld [vmem:[%s2681_s1 + $0x2f0] sm:$0xf]  ;;  %v1820_v39 = vld [vmem:[%s2681_s1 + $0x2f4] sm:$0xf0]  ;;  %v1755_v40 = vld [vmem:[%s2681_s1 + $0xf4] sm:$0xf]  ;;  %v1590_v47 = vor.u32 %v1822_v35, %v1589_v34  ;;  %v2215_v51 = vpack.c.bf16 %v52_v33, %v52_v33 }
  0x1f   :  { %706 = vmatpush.bf16.msra.mxu3 %v1414_v6  ;;  %v1327_v43 = vld [vmem:[%s2681_s1 + $0xf8] sm:$0xf0]  ;;  %v1509_v44 = vld [vmem:[%s2681_s1 + $0x260] sm:$0xf]  ;;  %v1802_v48 = vld [vmem:[%s2681_s1 + $0x264] sm:$0xf0]  ;;  %v1582_v52 = vor.u32 %v1820_v39, %v1581_v38 }
  0x20   :  { %680 = vmatpush.bf16.msra.mxu1 %v1286_v10  ;;  %v50_v45 = vld [vmem:[%s2680_s0] sm:$0xff]  ;;  %v1255_v50 = vld [vmem:[%s2681_s1 + $0x68] sm:$0xf0]  ;;  %v53_v53 = vld [vmem:[%s2680_s0 + $0x18] sm:$0xff]  ;;  %v1330_v55 = vor.u32 %v1755_v40, %v1327_v43  ;;  %v1510_v59 = vor.u32 %v1802_v48, %v1509_v44  ;;  %vm1172_vm1 = vcmask 80896   ;;  %s1193_s10 = sshll.u32 %s2689_s9, 4  ;;  %s1194_s10 = int_to_ptr.hbm [resolvable:$true] %s1193_s10 }
  0x21   :  { %668 = vmatpush.bf16.msra.mxu0 %v1214_v16  ;;  %v1737_v49 = vld [vmem:[%s2681_s1 + $0x64] sm:$0xf]  ;;  %v51_v54 = vld [vmem:[%s2680_s0 + $0x8] sm:$0xff]  ;;  %v1573_v56 = vld [vmem:[%s2681_s1 + $0x2e0] sm:$0xf]  ;;  %v2229_v58 = vpack.c.bf16 %v50_v45, %v50_v45  ;;  %v2249_v3 = vpack.c.bf16 %v53_v53, %v53_v53 }
  0x22   :  { %694 = vmatpush.bf16.msra.mxu2 %v1342_v20  ;;  %v1818_v57 = vld [vmem:[%s2681_s1 + $0x2e4] sm:$0xf0]  ;;  %v1258_v60 = vor.u32 %v1737_v49, %v1255_v50  ;;  %v1753_v61 = vld [vmem:[%s2681_s1 + $0xe4] sm:$0xf]  ;;  %v1319_v62 = vld [vmem:[%s2681_s1 + $0xe8] sm:$0xf0]  ;;  %v2251_v4 = vpack.c.bf16 %v51_v54, %v51_v54 }
  0x23   :  { %707 = vmatpush.bf16.msra.mxu3 %v1406_v21  ;;  %v1501_v63 = vld [vmem:[%s2681_s1 + $0x250] sm:$0xf]  ;;  %v1800_v0 = vld [vmem:[%s2681_s1 + $0x254] sm:$0xf0]  ;;  %v1735_v1 = vld [vmem:[%s2681_s1 + $0x54] sm:$0xf]  ;;  %v1574_v5 = vor.u32 %v1818_v57, %v1573_v56  ;;  %v1322_v6 = vor.u32 %v1753_v61, %v1319_v62 }
  0x24   :  { %681 = vmatpush.bf16.msra.mxu1 %v1278_v25  ;;  %v1247_v2 = vld [vmem:[%s2681_s1 + $0x58] sm:$0xf0]  ;;  %v1565_v7 = vld [vmem:[%s2681_s1 + $0x2d0] sm:$0xf]  ;;  %v1816_v8 = vld [vmem:[%s2681_s1 + $0x2d4] sm:$0xf0]  ;;  %v1502_v9 = vor.u32 %v1800_v0, %v1501_v63 }
  0x25   :  { %669 = vmatpush.bf16.msra.mxu0 %v1206_v32  ;;  %v1250_v10 = vor.u32 %v1735_v1, %v1247_v2  ;;  %v1751_v11 = vld [vmem:[%s2681_s1 + $0xd4] sm:$0xf]  ;;  %v1311_v12 = vld [vmem:[%s2681_s1 + $0xd8] sm:$0xf0]  ;;  %v1493_v13 = vld [vmem:[%s2681_s1 + $0x240] sm:$0xf]  ;;  %v1566_v17 = vor.u32 %v1816_v8, %v1565_v7 }
  0x26   :  { %695 = vmatpush.bf16.msra.mxu2 %v1334_v36  ;;  %v1798_v14 = vld [vmem:[%s2681_s1 + $0x244] sm:$0xf0]  ;;  %v1733_v15 = vld [vmem:[%s2681_s1 + $0x44] sm:$0xf]  ;;  %v1239_v16 = vld [vmem:[%s2681_s1 + $0x48] sm:$0xf0]  ;;  %v1314_v18 = vor.u32 %v1751_v11, %v1311_v12 }
  0x27   :  { %708 = vmatpush.bf16.msra.mxu3 %v1398_v37  ;;  %v1557_v19 = vld [vmem:[%s2681_s1 + $0x2c0] sm:$0xf]  ;;  %v1814_v20 = vld [vmem:[%s2681_s1 + $0x2c4] sm:$0xf0]  ;;  %v1494_v21 = vor.u32 %v1798_v14, %v1493_v13  ;;  %v1242_v22 = vor.u32 %v1733_v15, %v1239_v16  ;;  %v1749_v23 = vld [vmem:[%s2681_s1 + $0xc4] sm:$0xf] }
  0x28   :  { %682 = vmatpush.bf16.msra.mxu1 %v1270_v46  ;;  %670 = vmatmul.bf16.vlgmr.msra.gmra.mxu0 %v2229_v58  ;;  %v1303_v24 = vld [vmem:[%s2681_s1 + $0xc8] sm:$0xf0]  ;;  %v1485_v25 = vld [vmem:[%s2681_s1 + $0x230] sm:$0xf]  ;;  %v1796_v26 = vld [vmem:[%s2681_s1 + $0x234] sm:$0xf0]  ;;  %v1558_v29 = vor.u32 %v1814_v20, %v1557_v19 }
  0x29   :  { %714 = vmatpush.bf16.msrb.mxu0 %v1518_v41  ;;  %696 = vmatmul.bf16.vlgmr.msra.gmra.mxu2 %v2215_v51  ;;  %v1731_v27 = vld [vmem:[%s2681_s1 + $0x34] sm:$0xf]  ;;  %v1231_v28 = vld [vmem:[%s2681_s1 + $0x38] sm:$0xf0]  ;;  %v1306_v30 = vor.u32 %v1749_v23, %v1303_v24  ;;  %v1549_v31 = vld [vmem:[%s2681_s1 + $0x2b0] sm:$0xf]  ;;  %v1486_v34 = vor.u32 %v1796_v26, %v1485_v25 }
  0x2a   :  { %747 = vmatpush.bf16.msrb.mxu2 %v1590_v47  ;;  %709 = vmatmul.bf16.vlgmr.msra.gmra.mxu3 %v2249_v3  ;;  %v1812_v32 = vld [vmem:[%s2681_s1 + $0x2b4] sm:$0xf0]  ;;  %v56_v33 = vld [vmem:[%s2680_s0 + $0x30] sm:$0xff]  ;;  %v1234_v35 = vor.u32 %v1731_v27, %v1231_v28  ;;  %v1295_v37 = vld [vmem:[%s2681_s1 + $0xb8] sm:$0xf0] }
  0x2b   :  { %753 = vmatpush.bf16.msrb.mxu3 %v1266_v42  ;;  %683 = vmatmul.bf16.vlgmr.msra.gmra.mxu1 %v2251_v4  ;;  %v1747_v36 = vld [vmem:[%s2681_s1 + $0xb4] sm:$0xf]  ;;  %v1477_v38 = vld [vmem:[%s2681_s1 + $0x220] sm:$0xf]  ;;  %v1794_v39 = vld [vmem:[%s2681_s1 + $0x224] sm:$0xf0]  ;;  %v1550_v42 = vor.u32 %v1812_v32, %v1549_v31  ;;  %v2332_v43 = vpack.c.bf16 %v56_v33, %v56_v33 }
  0x2c   :  { %727 = vmatpush.bf16.msrb.mxu1 %v1582_v52  ;;  %v1729_v40 = vld [vmem:[%s2681_s1 + $0x24] sm:$0xf]  ;;  %v1223_v41 = vld [vmem:[%s2681_s1 + $0x28] sm:$0xf0]  ;;  %v1298_v44 = vor.u32 %v1747_v36, %v1295_v37  ;;  %v1541_v45 = vld [vmem:[%s2681_s1 + $0x2a0] sm:$0xf]  ;;  %v1478_v47 = vor.u32 %v1794_v39, %v1477_v38 }
  0x2d   :  { %715 = vmatpush.bf16.msrb.mxu0 %v1510_v59  ;;  %v1810_v46 = vld [vmem:[%s2681_s1 + $0x2a4] sm:$0xf0]  ;;  %v1226_v48 = vor.u32 %v1729_v40, %v1223_v41  ;;  %v1745_v49 = vld [vmem:[%s2681_s1 + $0xa4] sm:$0xf]  ;;  %v1287_v50 = vld [vmem:[%s2681_s1 + $0xa8] sm:$0xf0] }
  0x2e   :  { %766 = vmatpush.bf16.msra.mxu2 %v1330_v55  ;;  %v1469_v52 = vld [vmem:[%s2681_s1 + $0x210] sm:$0xf]  ;;  %v1792_v53 = vld [vmem:[%s2681_s1 + $0x214] sm:$0xf0]  ;;  %v1727_v54 = vld [vmem:[%s2681_s1 + $0x14] sm:$0xf]  ;;  %v1542_v56 = vor.u32 %v1810_v46, %v1541_v45  ;;  %v1290_v57 = vor.u32 %v1745_v49, %v1287_v50 }
  0x2f   :  { %754 = vmatpush.bf16.msrb.mxu3 %v1258_v60  ;;  %v1215_v55 = vld [vmem:[%s2681_s1 + $0x18] sm:$0xf0]  ;;  %v1533_v59 = vld [vmem:[%s2681_s1 + $0x290] sm:$0xf]  ;;  %v1808_v60 = vld [vmem:[%s2681_s1 + $0x294] sm:$0xf0]  ;;  %v1470_v62 = vor.u32 %v1792_v53, %v1469_v52 }
  0x30   :  { %728 = vmatpush.bf16.msrb.mxu1 %v1574_v5  ;;  %v1743_v61 = vld [vmem:[%s2681_s1 + $0x94] sm:$0xf]  ;;  %v1218_v63 = vor.u32 %v1727_v54, %v1215_v55  ;;  %v1279_v0 = vld [vmem:[%s2681_s1 + $0x98] sm:$0xf0]  ;;  %v1461_v1 = vld [vmem:[%s2681_s1 + $0x200] sm:$0xf]  ;;  %v1534_v8 = vor.u32 %v1808_v60, %v1533_v59 }
  0x31   :  { %716 = vmatpush.bf16.msrb.mxu0 %v1502_v9  ;;  %v1790_v2 = vld [vmem:[%s2681_s1 + $0x204] sm:$0xf0]  ;;  %v1725_v5 = vld [vmem:[%s2681_s1 + $0x4] sm:$0xf]  ;;  %v1771_v7 = vld [vmem:[%s2681_s1 + $0x174] sm:$0xf]  ;;  %v1282_v12 = vor.u32 %v1743_v61, %v1279_v0 }
  0x32   :  { %767 = vmatpush.bf16.msra.mxu2 %v1322_v6  ;;  %v1207_v6 = vld [vmem:[%s2681_s1 + $0x8] sm:$0xf0]  ;;  %v1391_v9 = vld [vmem:[%s2681_s1 + $0x178] sm:$0xf0]  ;;  %v1525_v13 = vld [vmem:[%s2681_s1 + $0x280] sm:$0xf]  ;;  %v1462_v16 = vor.u32 %v1790_v2, %v1461_v1 }
  0x33   :  { %755 = vmatpush.bf16.msrb.mxu3 %v1250_v10  ;;  %v1803_v10 = vld [vmem:[%s2681_s1 + $0x274] sm:$0xf]  ;;  %v1519_v11 = vld [vmem:[%s2681_s1 + $0x278] sm:$0xf0]  ;;  %v1806_v14 = vld [vmem:[%s2681_s1 + $0x284] sm:$0xf0] }
  0x34   :  { %729 = vmatpush.bf16.msrb.mxu1 %v1566_v17  ;;  %v54_v15 = vld [vmem:[%s2680_s0 + $0x20] sm:$0xff]  ;;  %v1210_v17 = vor.u32 %v1725_v5, %v1207_v6  ;;  %v1271_v19 = vld [vmem:[%s2681_s1 + $0x88] sm:$0xf0]  ;;  %v1787_v20 = vld [vmem:[%s2681_s1 + $0x1f4] sm:$0xf]  ;;  %v1526_v26 = vor.u32 %v1806_v14, %v1525_v13 }
  0x35   :  { %717 = vmatpush.bf16.msrb.mxu0 %v1494_v21  ;;  %v1394_v21 = vor.u32 %v1771_v7, %v1391_v9  ;;  %v1455_v23 = vld [vmem:[%s2681_s1 + $0x1f8] sm:$0xf0]  ;;  %v1819_v24 = vld [vmem:[%s2681_s1 + $0x2f4] sm:$0xf]  ;;  %v55_v27 = vld [vmem:[%s2680_s0 + $0x28] sm:$0xff] }
  0x36   :  { %768 = vmatpush.bf16.msra.mxu2 %v1314_v18  ;;  %v1741_v18 = vld [vmem:[%s2681_s1 + $0x84] sm:$0xf]  ;;  %v1583_v25 = vld [vmem:[%s2681_s1 + $0x2f8] sm:$0xf0]  ;;  %v1511_v33 = vld [vmem:[%s2681_s1 + $0x268] sm:$0xf0]  ;;  %v2443_v37 = vpack.c.bf16 %v55_v27, %v55_v27 }
  0x37   :  { %756 = vmatpush.bf16.msrb.mxu3 %v1242_v22  ;;  %v1522_v22 = vor.u32 %v1803_v10, %v1519_v11  ;;  %v1769_v28 = vld [vmem:[%s2681_s1 + $0x164] sm:$0xf]  ;;  %v1274_v31 = vor.u32 %v1741_v18, %v1271_v19  ;;  %v1447_v39 = vld [vmem:[%s2681_s1 + $0x1e8] sm:$0xf0]  ;;  %v1375_v45 = vld [vmem:[%s2681_s1 + $0x158] sm:$0xf0] }
  0x38   :  { %730 = vmatpush.bf16.msrb.mxu1 %v1558_v29  ;;  %v1383_v29 = vld [vmem:[%s2681_s1 + $0x168] sm:$0xf0]  ;;  %v1801_v32 = vld [vmem:[%s2681_s1 + $0x264] sm:$0xf]  ;;  %v1799_v46 = vld [vmem:[%s2681_s1 + $0x254] sm:$0xf] }
  0x39   :  { %718 = vmatpush.bf16.msrb.mxu0 %v1486_v34  ;;  %1595 = vmatmul.msk.bf16.vlgmr.msrb.gmra.mxu2 %vm658_vm0, %v2332_v43  ;;  %v1458_v34 = vor.u32 %v1787_v20, %v1455_v23  ;;  %v1785_v36 = vld [vmem:[%s2681_s1 + $0x1e4] sm:$0xf]  ;;  %v1386_v38 = vor.u32 %v1769_v28, %v1383_v29  ;;  %v1575_v41 = vld [vmem:[%s2681_s1 + $0x2e8] sm:$0xf0]  ;;  %v1783_v50 = vld [vmem:[%s2681_s1 + $0x1d4] sm:$0xf] }
  0x3a   :  { %769 = vmatpush.bf16.msra.mxu2 %v1306_v30  ;;  %v2432_v30 = vpack.c.bf16 %v54_v15, %v54_v15  ;;  %v1817_v40 = vld [vmem:[%s2681_s1 + $0x2e4] sm:$0xf]  ;;  %v1439_v52 = vld [vmem:[%s2681_s1 + $0x1d8] sm:$0xf0]  ;;  %v1815_v54 = vld [vmem:[%s2681_s1 + $0x2d4] sm:$0xf] }
  0x3b   :  { %757 = vmatpush.bf16.msrb.mxu3 %v1234_v35  ;;  %v1586_v35 = vor.u32 %v1819_v24, %v1583_v25  ;;  %v1578_v49 = vor.u32 %v1817_v40, %v1575_v41  ;;  %v1567_v55 = vld [vmem:[%s2681_s1 + $0x2d8] sm:$0xf0]  ;;  %v1367_v59 = vld [vmem:[%s2681_s1 + $0x148] sm:$0xf0]  ;;  %v1797_v60 = vld [vmem:[%s2681_s1 + $0x244] sm:$0xf] }
  0x3c   :  { %731 = vmatpush.bf16.msrb.mxu1 %v1550_v42  ;;  %v1514_v42 = vor.u32 %v1801_v32, %v1511_v33  ;;  %v1495_v61 = vld [vmem:[%s2681_s1 + $0x248] sm:$0xf0]  ;;  %v1781_v0 = vld [vmem:[%s2681_s1 + $0x1c4] sm:$0xf]  ;;  %v1763_v6 = vld [vmem:[%s2681_s1 + $0x134] sm:$0xf] }
  0x3d   :  { %719 = vmatpush.bf16.msrb.mxu0 %v1478_v47  ;;  %v1503_v47 = vld [vmem:[%s2681_s1 + $0x258] sm:$0xf0]  ;;  %v1813_v2 = vld [vmem:[%s2681_s1 + $0x2c4] sm:$0xf]  ;;  %v1498_v5 = vor.u32 %v1797_v60, %v1495_v61  ;;  %v1811_v15 = vld [vmem:[%s2681_s1 + $0x2b4] sm:$0xf] }
  0x3e   :  { %770 = vmatpush.bf16.msra.mxu2 %v1298_v44  ;;  %v1767_v44 = vld [vmem:[%s2681_s1 + $0x154] sm:$0xf]  ;;  %v1359_v7 = vld [vmem:[%s2681_s1 + $0x138] sm:$0xf0]  ;;  %v1761_v18 = vld [vmem:[%s2681_s1 + $0x124] sm:$0xf] }
  0x3f   :  { %758 = vmatpush.bf16.msrb.mxu3 %v1226_v48  ;;  %v1450_v48 = vor.u32 %v1785_v36, %v1447_v39  ;;  %v1378_v53 = vor.u32 %v1767_v44, %v1375_v45  ;;  %v1487_v9 = vld [vmem:[%s2681_s1 + $0x238] sm:$0xf0]  ;;  %v1362_v13 = vor.u32 %v1763_v6, %v1359_v7  ;;  %v1351_v19 = vld [vmem:[%s2681_s1 + $0x128] sm:$0xf0]  ;;  %v1793_v20 = vld [vmem:[%s2681_s1 + $0x224] sm:$0xf] }
  0x40   :  { %732 = vmatpush.bf16.msrb.mxu1 %v1542_v56  ;;  %v1765_v56 = vld [vmem:[%s2681_s1 + $0x144] sm:$0xf]  ;;  %v1423_v14 = vld [vmem:[%s2681_s1 + $0x1b8] sm:$0xf0]  ;;  %v1354_v25 = vor.u32 %v1761_v18, %v1351_v19  ;;  %v1543_v28 = vld [vmem:[%s2681_s1 + $0x2a8] sm:$0xf0] }
  0x41   :  { %720 = vmatpush.bf16.msrb.mxu0 %v1470_v62  ;;  %v1442_v62 = vor.u32 %v1783_v50, %v1439_v52  ;;  %v1370_v1 = vor.u32 %v1765_v56, %v1367_v59  ;;  %v1777_v24 = vld [vmem:[%s2681_s1 + $0x1a4] sm:$0xf]  ;;  %v1343_v32 = vld [vmem:[%s2681_s1 + $0x118] sm:$0xf0]  ;;  %v1791_v33 = vld [vmem:[%s2681_s1 + $0x214] sm:$0xf] }
  0x42   :  { %771 = vmatpush.bf16.msra.mxu2 %v1290_v57  ;;  %v1506_v57 = vor.u32 %v1799_v46, %v1503_v47  ;;  %v1809_v27 = vld [vmem:[%s2681_s1 + $0x2a4] sm:$0xf]  ;;  %v1407_v40 = vld [vmem:[%s2681_s1 + $0x198] sm:$0xf0]  ;;  %v1807_v41 = vld [vmem:[%s2681_s1 + $0x294] sm:$0xf] }
  0x43   :  { %759 = vmatpush.bf16.msrb.mxu3 %v1218_v63  ;;  %v1570_v63 = vor.u32 %v1815_v54, %v1567_v55  ;;  %v1546_v36 = vor.u32 %v1809_v27, %v1543_v28  ;;  %v1757_v45 = vld [vmem:[%s2681_s1 + $0x104] sm:$0xf]  ;;  %v1335_v46 = vld [vmem:[%s2681_s1 + $0x108] sm:$0xf0]  ;;  %v1834_v27 = vld [vmem:[#allocation2 + $0x58] sm:$0xff] }
  0x44   :  { %733 = vmatpush.bf16.msrb.mxu1 %v1534_v8  ;;  %v1795_v8 = vld [vmem:[%s2681_s1 + $0x234] sm:$0xf]  ;;  %v1789_v47 = vld [vmem:[%s2681_s1 + $0x204] sm:$0xf]  ;;  %v1591_v50 = vld [vmem:[%s2681_s1 + $0x308] sm:$0xf0]  ;;  %v1338_v54 = vor.u32 %v1757_v45, %v1335_v46 }
  0x45   :  { %721 = vmatpush.bf16.msrb.mxu0 %v1462_v16  ;;  %v1551_v16 = vld [vmem:[%s2681_s1 + $0x2b8] sm:$0xf0]  ;;  %v1773_v55 = vld [vmem:[%s2681_s1 + $0x184] sm:$0xf]  ;;  %v1399_v56 = vld [vmem:[%s2681_s1 + $0x188] sm:$0xf0] }
  0x46   :  { %772 = vmatpush.bf16.msra.mxu2 %v1282_v12  ;;  %v1779_v12 = vld [vmem:[%s2681_s1 + $0x1b4] sm:$0xf]  ;;  %v1554_v23 = vor.u32 %v1811_v15, %v1551_v16  ;;  %v1805_v59 = vld [vmem:[%s2681_s1 + $0x284] sm:$0xf]  ;;  %v1527_v60 = vld [vmem:[%s2681_s1 + $0x288] sm:$0xf0] }
  0x47   :  { %760 = vmatpush.bf16.msrb.mxu3 %v1210_v17  ;;  %v1490_v17 = vor.u32 %v1795_v8, %v1487_v9  ;;  %v1838_v9 = vld [vmem:[#allocation2 + $0x78] sm:$0xff]  ;;  %v1836_v19 = vld [vmem:[#allocation2 + $0x68] sm:$0xff] }
  0x48   :  { %734 = vmatpush.bf16.msrb.mxu1 %v1526_v26  ;;  %722 = vmatmul.bf16.vlgmr.msrb.gmra.mxu0 %v2432_v30  ;;  %v1415_v26 = vld [vmem:[%s2681_s1 + $0x1a8] sm:$0xf0] }
  0x49   :  { %779 = vmatpush.bf16.msra.mxu0 %v1394_v21  ;;  %v1479_v21 = vld [vmem:[%s2681_s1 + $0x228] sm:$0xf0] }
  0x4a   :  { %773 = vmatpush.bf16.msra.mxu2 %v1274_v31  ;;  %761 = vmatmul.bf16.vlgmr.msrb.gmra.mxu3 %v2229_v58  ;;  %v1559_v58 = vld [vmem:[%s2681_s1 + $0x2c8] sm:$0xf0]  ;;  %v1482_v29 = vor.u32 %v1793_v20, %v1479_v21  ;;  %v1759_v31 = vld [vmem:[%s2681_s1 + $0x114] sm:$0xf] }
  0x4b   :  { %805 = vmatpush.bf16.msra.mxu3 %v1522_v22  ;;  %735 = vmatmul.bf16.vlgmr.msrb.gmra.mxu1 %v2443_v37  ;;  %v1562_v11 = vor.u32 %v1813_v2, %v1559_v58  ;;  %v1426_v22 = vor.u32 %v1779_v12, %v1423_v14  ;;  %v1346_v39 = vor.u32 %v1759_v31, %v1343_v32  ;;  %v1827_v2 = vld [vmem:[#allocation2 + $0x20] sm:$0xff]  ;;  %v1826_v58 = vld [vmem:[#allocation2 + $0x18] sm:$0xff]  ;;  %v1833_v32 = vld [vmem:[#allocation2 + $0x50] sm:$0xff] }
  0x4c   :  { %792 = vmatpush.bf16.msra.mxu1 %v1458_v34  ;;  %v1471_v34 = vld [vmem:[%s2681_s1 + $0x218] sm:$0xf0] }
  0x4d   :  { %780 = vmatpush.bf16.msra.mxu0 %v1386_v38  ;;  %774 = vmatmul.bf16.vlgmr.msra.gmra.mxu2 %v2251_v4  ;;  %v1431_v4 = vld [vmem:[%s2681_s1 + $0x1c8] sm:$0xf0]  ;;  %v1775_v38 = vld [vmem:[%s2681_s1 + $0x194] sm:$0xf]  ;;  %v1474_v44 = vor.u32 %v1791_v33, %v1471_v34 }
  0x4e   :  { %818 = vmatpush.bf16.msrb.mxu2 %v1586_v35  ;;  %v1434_v10 = vor.u32 %v1781_v0, %v1431_v4  ;;  %v1418_v35 = vor.u32 %v1777_v24, %v1415_v26  ;;  %v1410_v52 = vor.u32 %v1775_v38, %v1407_v40  ;;  %v1830_v0 = vld [vmem:[#allocation2 + $0x38] sm:$0xff]  ;;  %v1828_v4 = vld [vmem:[#allocation2 + $0x28] sm:$0xff] }
  0x4f   :  { %806 = vmatpush.bf16.msra.mxu3 %v1514_v42  ;;  %v1535_v42 = vld [vmem:[%s2681_s1 + $0x298] sm:$0xf0]  ;;  %v1832_v38 = vld [vmem:[#allocation2 + $0x48] sm:$0xff] }
  0x50   :  { %793 = vmatpush.bf16.msra.mxu1 %v1450_v48  ;;  %v1463_v48 = vld [vmem:[%s2681_s1 + $0x208] sm:$0xf0] }
  0x51   :  { %781 = vmatpush.bf16.msra.mxu0 %v1378_v53  ;;  %v1538_v53 = vor.u32 %v1807_v41, %v1535_v42 }
  0x52   :  { %819 = vmatpush.bf16.msrb.mxu2 %v1578_v49  ;;  %v1821_v49 = vld [vmem:[%s2681_s1 + $0x304] sm:$0xf] }
  0x53   :  { %807 = vmatpush.bf16.msra.mxu3 %v1506_v57  ;;  %v1466_v57 = vor.u32 %v1789_v47, %v1463_v48  ;;  %v1594_v61 = vor.u32 %v1821_v49, %v1591_v50 }
  0x54   :  { %794 = vmatpush.bf16.msra.mxu1 %v1442_v62  ;;  %v1402_v62 = vor.u32 %v1773_v55, %v1399_v56 }
  0x55   :  { %782 = vmatpush.bf16.msra.mxu0 %v1370_v1  ;;  %v1829_v1 = vld [vmem:[#allocation2 + $0x30] sm:$0xff] }
  0x56   :  { %820 = vmatpush.bf16.msrb.mxu2 %v1570_v63  ;;  %v1530_v63 = vor.u32 %v1805_v59, %v1527_v60 }
  0x57   :  { %808 = vmatpush.bf16.msra.mxu3 %v1498_v5 }
  0x58   :  { %795 = vmatpush.bf16.msra.mxu1 %v1434_v10 }
  0x59   :  { %783 = vmatpush.bf16.msra.mxu0 %v1362_v13  ;;  %v1837_v13 = vld [vmem:[#allocation2 + $0x70] sm:$0xff] }
  0x5a   :  { %821 = vmatpush.bf16.msrb.mxu2 %v1562_v11 }
  0x5b   :  { %809 = vmatpush.bf16.msra.mxu3 %v1490_v17 }
  0x5c   :  { %796 = vmatpush.bf16.msra.mxu1 %v1426_v22  ;;  %v1835_v22 = vld [vmem:[#allocation2 + $0x60] sm:$0xff] }
  0x5d   :  { %784 = vmatpush.bf16.msra.mxu0 %v1354_v25 }
  0x5e   :  { %822 = vmatpush.bf16.msrb.mxu2 %v1554_v23 }
  0x5f   :  { %810 = vmatpush.bf16.msra.mxu3 %v1482_v29 }
  0x60   :  { %797 = vmatpush.bf16.msra.mxu1 %v1418_v35 }
  0x61   :  { %785 = vmatpush.bf16.msra.mxu0 %v1346_v39  ;;  %v1831_v39 = vld [vmem:[#allocation2 + $0x40] sm:$0xff] }
  0x62   :  { %823 = vmatpush.bf16.msrb.mxu2 %v1546_v36 }
  0x63   :  { %811 = vmatpush.bf16.msra.mxu3 %v1474_v44 }
  0x64   :  { %798 = vmatpush.bf16.msra.mxu1 %v1410_v52 }
  0x65   :  { %786 = vmatpush.bf16.msra.mxu0 %v1338_v54 }
  0x66   :  { %824 = vmatpush.bf16.msrb.mxu2 %v1538_v53 }
  0x67   :  { %812 = vmatpush.bf16.msra.mxu3 %v1466_v57 }
  0x68   :  { %799 = vmatpush.bf16.msra.mxu1 %v1402_v62  ;;  %787 = vmatmul.bf16.vlgmr.msra.gmra.mxu0 %v2215_v51  ;;  %v1825_v51 = vld [vmem:[#allocation2 + $0x10] sm:$0xff] }
  0x69   :  { %838 = vmatpush.bf16.msrb.mxu0 %v1594_v61 }
  0x6a   :  { %813 = vmatmul.bf16.vlgmr.msra.gmra.mxu3 %v2432_v30  ;;  %825 = vmatpush.bf16.msrb.mxu2 %v1530_v63  ;;  %v1824_v30 = vld [vmem:[#allocation2 + $0x8] sm:$0xff] }
  0x6b   :  { %800 = vmatmul.bf16.vlgmr.msra.gmra.mxu1 %v2249_v3  ;;  %993 = vmatpush.bf16.msrb.mxu3 %v1838_v9  ;;  %v1851_v9 = vld [vmem:[%s2687_s7 + $0x20] sm:$0xff] }
  0x6c   :  { %980 = vmatpush.bf16.msrb.mxu1 %v1830_v0 }
  0x6d   :  { %826 = vmatmul.bf16.vlgmr.msrb.gmra.mxu2 %v2443_v37  ;;  %v1823_v37 = vld [vmem:[#allocation2] sm:$0xff] }
  0x6f   :  { %994 = vmatpush.bf16.msrb.mxu3 %v1837_v13 }
  0x70   :  { %981 = vmatpush.bf16.msrb.mxu1 %v1829_v1  ;;  %v1846_v1 = vld [vmem:[%s2685_s5 + $0x38] sm:$0xff] }
  0x71   :  { %1076 = vmatpush.bf16.msra.mxu0 %v1846_v1 }
  0x73   :  { %995 = vmatpush.bf16.msrb.mxu3 %v1836_v19  ;;  %v1848_v19 = vld [vmem:[%s2687_s7 + $0x8] sm:$0xff] }
  0x74   :  { %982 = vmatpush.bf16.msrb.mxu1 %v1828_v4  ;;  %v1845_v4 = vld [vmem:[%s2685_s5 + $0x30] sm:$0xff] }
  0x75   :  { %1077 = vmatpush.bf16.msra.mxu0 %v1845_v4 }
  0x77   :  { %996 = vmatpush.bf16.msrb.mxu3 %v1835_v22 }
  0x78   :  { %1596 = vmatmul.msk.bf16.vlgmr.msrb.gmra.mxu0 %vm658_vm0, %v2332_v43  ;;  %983 = vmatpush.bf16.msrb.mxu1 %v1827_v2  ;;  %v162_v43 = vld [vmem:[%s2682_s2] sm:$0x3]  ;;  %v1844_v2 = vld [vmem:[%s2685_s5 + $0x28] sm:$0xff] }
  0x79   :  { %v164_v11 = vperm.slane %v162_v43, 0  ;;  %v165_v42 = vperm.slane %v162_v43, 1  ;;  %1078 = vmatpush.bf16.msra.mxu0 %v1844_v2  ;;  %v1854_v43 = vld [vmem:[%s2687_s7 + $0x38] sm:$0xff] }
  0x7a   :  { %1159 = vmatpush.bf16.msra.mxu2 %v1854_v43 }
  0x7b   :  { %997 = vmatpush.bf16.msrb.mxu3 %v1834_v27  ;;  %v1861_v27 = vld [vmem:[%s2688_s8] ss:$0 sm:$0xff] }
  0x7c   :  { %984 = vmatpush.bf16.msrb.mxu1 %v1826_v58  ;;  %v1843_v58 = vld [vmem:[%s2685_s5 + $0x20] sm:$0xff] }
  0x7d   :  { %1079 = vmatpush.bf16.msra.mxu0 %v1843_v58 }
  0x7f   :  { %998 = vmatpush.bf16.msrb.mxu3 %v1833_v32 }
  0x80   :  { %985 = vmatpush.bf16.msrb.mxu1 %v1825_v51  ;;  %v1842_v51 = vld [vmem:[%s2685_s5 + $0x18] sm:$0xff] }
  0x81   :  { %1080 = vmatpush.bf16.msra.mxu0 %v1842_v51 }
  0x83   :  { %999 = vmatpush.bf16.msrb.mxu3 %v1832_v38 }
  0x84   :  { %986 = vmatpush.bf16.msrb.mxu1 %v1824_v30  ;;  %v1841_v30 = vld [vmem:[%s2685_s5 + $0x10] sm:$0xff] }
  0x85   :  { %1081 = vmatpush.bf16.msra.mxu0 %v1841_v30 }
  0x87   :  { %1000 = vmatpush.bf16.msrb.mxu3 %v1831_v39 }
  0x88   :  { %987 = vmatpush.bf16.msrb.mxu1 %v1823_v37  ;;  %v1840_v37 = vld [vmem:[%s2685_s5 + $0x8] sm:$0xff] }
  0x89   :  { %1082 = vmatpush.bf16.msra.mxu0 %v1840_v37 }
  0xa5   :  { %v671_v5 = vpop.f32.mrf.mxu0 }
  0xa6   :  { %v672_v14 = vadd.f32 %v671_v5, %v164_v11  ;;  %v1849_v11 = vld [vmem:[%s2687_s7 + $0x10] sm:$0xff] }
  0xa8   :  { %v684_v3 = vpop.f32.mrf.mxu1 }
  0xa9   :  { %v685_v16 = vadd.f32 %v684_v3, %v672_v14 }
  0xac   :  { %v697_v6 = vpop.f32.mrf.mxu2 }
  0xad   :  { %v710_v7 = vpop.f32.mrf.mxu3  ;;  %v673_v8 = vpop.f32.mrf.mxu0  ;;  %v698_v18 = vadd.f32 %v697_v6, %v685_v16  ;;  %v1839_v6 = vld [vmem:[%s2685_s5] sm:$0xff] }
  0xae   :  { %1083 = vmatpush.bf16.msra.mxu0 %v1839_v6  ;;  %v1852_v8 = vld [vmem:[%s2687_s7 + $0x28] sm:$0xff] }
  0xaf   :  { %v711_v20 = vadd.f32 %v710_v7, %v698_v18  ;;  %v1853_v7 = vld [vmem:[%s2687_s7 + $0x30] sm:$0xff] }
  0xb0   :  { %v686_v10 = vpop.f32.mrf.mxu1  ;;  %1160 = vmatpush.bf16.msra.mxu2 %v1853_v7 }
  0xb1   :  { %v1850_v10 = vld [vmem:[%s2687_s7 + $0x18] sm:$0xff] }
  0xb4   :  { %v699_v12 = vpop.f32.mrf.mxu2  ;;  %1161 = vmatpush.bf16.msra.mxu2 %v1852_v8 }
  0xb5   :  { %v712_v15 = vpop.f32.mrf.mxu3  ;;  %v1859_v12 = vld [vmem:[%s2684_s4] ss:$0 sm:$0xff] }
  0xb8   :  { %1162 = vmatpush.bf16.msra.mxu2 %v1851_v9 }
  0xbc   :  { %v749_v17 = vpop.f32.mrf.mxu2  ;;  %1163 = vmatpush.bf16.msra.mxu2 %v1850_v10 }
  0xc0   :  { %1164 = vmatpush.bf16.msra.mxu2 %v1849_v11 }
  0xc4   :  { %v751_v24 = vpop.f32.mrf.mxu2  ;;  %1165 = vmatpush.bf16.msra.mxu2 %v1848_v19 }
  0xc5   :  { %v723_v21 = vpop.f32.mrf.mxu0 }
  0xc6   :  { %v724_v23 = vadd.f32 %v723_v21, %v711_v20  ;;  %v1847_v20 = vld [vmem:[%s2687_s7] sm:$0xff] }
  0xc7   :  { %v1860_v21 = vld [vmem:[%s2686_s6] ss:$0 sm:$0xff]  ;;  %s1921_s6 = smov [#allocation5]  }
  0xc8   :  { %v736_v25 = vpop.f32.mrf.mxu1  ;;  %1166 = vmatpush.bf16.msra.mxu2 %v1847_v20  ;;  %s1191_s7 = sshll.u32 %s1921_s6, 4  ;;  %s1192_s7 = int_to_ptr.vmem [resolvable:$true] %s1191_s7 }
  0xc9   :  { %v737_v26 = vadd.f32 %v736_v25, %v724_v23 }
  0xcb   :  { %v750_v28 = vadd.f32 %v749_v17, %v737_v26 }
  0xcd   :  { %v844_v29 = vmax.f32 %v750_v28, 0.0  ;;  %v725_v31 = vpop.f32.mrf.mxu0  ;;  %v762_v35 = vpop.f32.mrf.mxu3 }
  0xce   :  { %v763_v44 = vadd.f32 %v762_v35, %v165_v42 }
  0xcf   :  { %v846_v33 = vpack.c.bf16 %v844_v29, %v844_v29 }
  0xd0   :  { %v775_v34 = vpop.f32.mrf.mxu2  ;;  %v738_v36 = vpop.f32.mrf.mxu1 }
  0xd1   :  { %988 = vmatmul.bf16.vlgmr.msrb.gmra.mxu1 %v846_v33  ;;  %v776_v46 = vadd.f32 %v775_v34, %v763_v44 }
  0xd5   :  { %v764_v41 = vpop.f32.mrf.mxu3 }
  0xd8   :  { %v777_v40 = vpop.f32.mrf.mxu2 }
  0xe5   :  { %v788_v45 = vpop.f32.mrf.mxu0 }
  0xe6   :  { %v789_v48 = vadd.f32 %v788_v45, %v776_v46 }
  0xe8   :  { %v801_v47 = vpop.f32.mrf.mxu1 }
  0xe9   :  { %v802_v52 = vadd.f32 %v801_v47, %v789_v48 }
  0xed   :  { %v814_v49 = vpop.f32.mrf.mxu3  ;;  %v790_v50 = vpop.f32.mrf.mxu0 }
  0xee   :  { %v815_v54 = vadd.f32 %v814_v49, %v802_v52 }
  0xf0   :  { %v827_v53 = vpop.f32.mrf.mxu2  ;;  %v803_v55 = vpop.f32.mrf.mxu1 }
  0xf1   :  { %v828_v56 = vadd.f32 %v827_v53, %v815_v54 }
  0xf5   :  { %v816_v57 = vpop.f32.mrf.mxu3  ;;  %v840_v59 = vpop.f32.mrf.mxu0 }
  0xf6   :  { %v841_v60 = vadd.f32 %v840_v59, %v828_v56 }
  0xf8   :  { %v829_v61 = vpop.f32.mrf.mxu2  ;;  %v845_v62 = vmax.f32 %v841_v60, 0.0 }
  0xfa   :  { %v847_v63 = vpack.c.bf16 %v845_v62, %v845_v62 }
  0xfc   :  { %1001 = vmatmul.bf16.vlgmr.msrb.gmra.mxu3 %v847_v63 }
  0xfd   :  { %v842_v0 = vpop.f32.mrf.mxu0 }
 0x14e   :  { %v989_v5 = vpop.f32.mrf.mxu1 }
 0x14f   :  { %v990_v13 = vadd.f32 %v1859_v12, %v989_v5 }
 0x156   :  { %v991_v3 = vpop.f32.mrf.mxu1 }
 0x17f   :  { %v1002_v14 = vpop.f32.mrf.mxu3 }
 0x180   :  { %v1003_v15 = vadd.f32 %v1002_v14, %v990_v13 }
 0x182   :  { %v1006_v16 = vmax.f32 %v1003_v15, 0.0 }
 0x184   :  { %v1007_v17 = vpack.c.bf16 %v1006_v16, %v1006_v16 }
 0x186   :  { %1084 = vmatmul.bf16.vlgmr.msra.gmra.mxu0 %v1007_v17 }
 0x187   :  { %v1004_v18 = vpop.f32.mrf.mxu3 }
 0x203   :  { %v1085_v22 = vpop.f32.mrf.mxu0 }
 0x204   :  { %v1086_v23 = vadd.f32 %v1860_v21, %v1085_v22 }
 0x206   :  { %v1089_v24 = vmax.f32 %v1086_v23, 0.0 }
 0x208   :  { %v1090_v25 = vpack.c.bf16 %v1089_v24, %v1089_v24 }
 0x20a   :  { %1167 = vmatmul.bf16.vlgmr.msra.gmra.mxu2 %v1090_v25 }
 0x20b   :  { %v1087_v26 = vpop.f32.mrf.mxu0 }
 0x28d   :  { %v1168_v28 = vpop.f32.mrf.mxu2 }
 0x28e   :  { %v1169_v29 = vadd.f32 %v1861_v27, %v1168_v28 }
 0x290   :  { %v1173_v31 = vsel %vm1172_vm1, %v1169_v29, -inf }
 0x291   :  { %1174 = vmax.xlane.f32.xlu0 %v1173_v31 }
 0x295   :  { %v1170_v32 = vpop.f32.mrf.mxu2 }
 0x304   :  { %v1175_v33 = vpop.xlane.xlu0 %1174 }
 0x305   :  { %v1176_v34 = vsub.f32 %v1169_v29, %v1175_v33 }
 0x307   :  { %v1177_v35 = vmul.f32 1.442695, %v1176_v34 }
 0x309   :  { %1862 = vpow2.f32 %v1177_v35 }
 0x30f   :  { %v1863_v36 = vpop.eup %1862 }
 0x310   :  { %v1179_v38 = vsel %vm1172_vm1, %v1863_v36, 0.0 }
 0x311   :  { %1180 = vadd.xlane.f32.xlu0 %v1179_v38 }
 0x384   :  { %v1181_v39 = vpop.xlane.xlu0 %1180 }
 0x385   :  { %1864 = vlog2.f32 %v1181_v39 }
 0x38b   :  { %v1865_v40 = vpop.eup %1864 }
 0x38c   :  { %v1183_v41 = vmul.f32 0.6931472, %v1865_v40 }
 0x38e   :  { %v1184_v42 = vsub.f32 %v1176_v34, %v1183_v41 }
 0x390   :  { %1185 = vst.msk [vmem:[#allocation5] sm:$0xff] %vm1172_vm1, %v1184_v42 }
 0x391   :  { %1196 = dma.vmem_to_hbm [thread:$0]  %s1192_s7, 128, %s1194_s10, [#allocation4]  }
 0x392   :  { %1916 = dma.done.wait [#allocation4], 128  }
 0x393   :  { %1917 = vsyncadd [#allocation4], 4294967168 }
 0x394   :  { %1201 = vsyncpa [#allocation3], 1 }
 0x395   :  { %1202 = vsyncpa [#allocation4], 1 }

</bundles_post_ra>
